<compile_context>
chip_gen: v7x
topology: tpu7x:2x2x1
jax: 0.10.0
libtpu: 0.0.40
codegen_flags: <defaults>
</compile_context>

<pallas_src>
import functools

import jax
import jax.numpy as jnp
from jax import lax
from jax.experimental import pallas as pl
from jax.experimental.pallas import tpu as pltpu

_LANE = 128
_SUB = 8
_MAX_BLOCK_ROWS = 2048  # 2048*128*4B = 1 MiB per f32 input block


def _round_up(x, m):
    return ((x + m - 1) // m) * m


def _disc_loss_kernel(real_ref, fake_ref, out_ref, *, gan_type, n_real, n_fake,
                      block_rows, inner_steps, mask_real, mask_fake):
    p = pl.program_id(0)   # parallel chunk (TensorCore shard on v7x)
    i = pl.program_id(1)   # sequential reduction step

    @pl.when(i == 0)
    def _init():
        out_ref[...] = jnp.zeros_like(out_ref)

    r = real_ref[...].astype(jnp.float32)
    f = fake_ref[...].astype(jnp.float32)

    if gan_type == "vanilla":
        # BCE(x, 1) = -clamp(log x, -100) = min(-log x, 100); BCE(x, 0) on (1-x).
        loss_r = jnp.minimum(-jnp.log(r), 100.0)
        loss_f = jnp.minimum(-jnp.log(1.0 - f), 100.0)
    elif gan_type == "lsgan":
        loss_r = (r - 1.0) * (r - 1.0)
        loss_f = f * f
    else:
        # TODO(synk): 'wgan' defines no loss in the reference forward().
        raise NotImplementedError(gan_type)

    if mask_real or mask_fake:
        # Zero out padded / clamped-duplicate / out-of-bounds elements.
        blk = p * inner_steps + i
        flat0 = blk * (block_rows * _LANE)
        row_io = lax.broadcasted_iota(jnp.int32, (block_rows, _LANE), 0)
        lane_io = lax.broadcasted_iota(jnp.int32, (block_rows, _LANE), 1)
        flat = flat0 + row_io * _LANE + lane_io
        if mask_real:
            loss_r = jnp.where(flat < n_real, loss_r, 0.0)
        if mask_fake:
            loss_f = jnp.where(flat < n_fake, loss_f, 0.0)

    # Reduce only over the row-group axis (pure cross-vreg VPU adds) and
    # accumulate into the resident (8,128) output slabs.
    out_ref[0, 0] += loss_r.reshape(-1, _SUB, _LANE).sum(axis=0)
    out_ref[0, 1] += loss_f.reshape(-1, _SUB, _LANE).sum(axis=0)


def disc_loss(disc_real, disc_fake, gan_type="vanilla", eps=1e-8,
              max_block_rows=_MAX_BLOCK_ROWS):
    """Pallas implementation of DiscLoss.forward. Returns a float32 scalar."""
    n_real = int(disc_real.size)
    n_fake = int(disc_fake.size)
    assert n_real > 0 and n_fake > 0

    # Lane-dense 2D slab layout shared by both inputs (rows multiple of 16 so
    # f32 and bf16 tilings are both satisfied).
    rows = _round_up(max(pl.cdiv(n_real, _LANE), pl.cdiv(n_fake, _LANE)), 16)
    block_rows = min(_round_up(max_block_rows, 16), rows)
    nblocks = pl.cdiv(rows, block_rows)
    num_cores = 2 if nblocks >= 2 else 1        # megacore split (v7x); no-op elsewhere
    inner_steps = pl.cdiv(nblocks, num_cores)

    def _to_2d(x):
        flat = x.reshape(-1)                    # native dtype; upcast in-kernel
        pad = rows * _LANE - flat.size
        if pad:                                 # only for non-16*128-aligned sizes
            flat = jnp.pad(flat, (0, pad))
        return flat.reshape(rows, _LANE)

    real_2d = _to_2d(disc_real)
    fake_2d = _to_2d(disc_fake)

    coverage = num_cores * inner_steps * block_rows * _LANE
    mask_real = coverage != n_real
    mask_fake = coverage != n_fake

    def in_map(p, i):
        # Clamp so grid over-run (odd nblocks split across cores) stays in-bounds;
        # the in-kernel flat-index mask zeroes those duplicated contributions.
        return (jnp.minimum(p * inner_steps + i, nblocks - 1), 0)

    kernel = functools.partial(
        _disc_loss_kernel, gan_type=gan_type, n_real=n_real, n_fake=n_fake,
        block_rows=block_rows, inner_steps=inner_steps,
        mask_real=mask_real, mask_fake=mask_fake)

    partials = pl.pallas_call(
        kernel,
        out_shape=jax.ShapeDtypeStruct((num_cores, 2, _SUB, _LANE), jnp.float32),
        grid_spec=pltpu.PrefetchScalarGridSpec(
            num_scalar_prefetch=0,
            grid=(num_cores, inner_steps),
            in_specs=[
                pl.BlockSpec((block_rows, _LANE), in_map),
                pl.BlockSpec((block_rows, _LANE), in_map),
            ],
            out_specs=pl.BlockSpec((1, 2, _SUB, _LANE),
                                   lambda p, i: (p, 0, 0, 0)),
        ),
        compiler_params=pltpu.CompilerParams(
            dimension_semantics=("parallel", "arbitrary")),
    )(real_2d, fake_2d)

    sums = jnp.sum(partials, axis=(0, 2, 3))    # (2,): [sum_real, sum_fake]
    loss_real = sums[0] / jnp.float32(n_real)
    loss_fake = sums[1] / jnp.float32(n_fake)
    return (loss_real + loss_fake) * 0.5 + jnp.float32(eps)


def _reference(disc_real, disc_fake, gan_type="vanilla", eps=1e-8):
    r = disc_real.astype(jnp.float32)
    f = disc_fake.astype(jnp.float32)
    if gan_type == "vanilla":
        lr = jnp.mean(-jnp.maximum(jnp.log(r), -100.0))
        lf = jnp.mean(-jnp.maximum(jnp.log(1.0 - f), -100.0))
    else:
        lr = jnp.mean((r - 1.0) ** 2)
        lf = jnp.mean(f ** 2)
    return (lr + lf) * 0.5 + eps


if __name__ == "__main__":
    key = jax.random.PRNGKey(0)
    k1, k2, k3, k4 = jax.random.split(key, 4)

    # Primary case: NCHW discriminator outputs in (0,1) (post-sigmoid) for BCE.
    disc_real = jax.nn.sigmoid(jax.random.normal(k1, (2, 4, 16, 16), jnp.float32))
    disc_fake = jax.nn.sigmoid(jax.random.normal(k2, (2, 4, 16, 16), jnp.float32))

    out = jax.block_until_ready(disc_loss(disc_real, disc_fake, gan_type="vanilla"))
    ref = _reference(disc_real, disc_fake, gan_type="vanilla")
    assert jnp.allclose(out, ref, rtol=1e-5, atol=1e-6), (out, ref)

    out_ls = jax.block_until_ready(disc_loss(disc_real, disc_fake, gan_type="lsgan"))
    ref_ls = _reference(disc_real, disc_fake, gan_type="lsgan")
    assert jnp.allclose(out_ls, ref_ls, rtol=1e-5, atol=1e-6), (out_ls, ref_ls)

    # Ragged (non lane-aligned) shape: exercises in-kernel tail masking.
    rr = jax.nn.sigmoid(jax.random.normal(k3, (2, 3, 7, 11), jnp.float32))
    ff = jax.nn.sigmoid(jax.random.normal(k4, (2, 3, 7, 11), jnp.float32))
    out_m = jax.block_until_ready(disc_loss(rr, ff, gan_type="vanilla"))
    ref_m = _reference(rr, ff, gan_type="vanilla")
    assert jnp.allclose(out_m, ref_m, rtol=1e-5, atol=1e-6), (out_m, ref_m)

    # Small block size forces a multi-block grid with the 2-way parallel axis
    # and a clamped/masked over-run block (odd block count split over 2 chunks).
    rb = jax.nn.sigmoid(jax.random.normal(k3, (2, 4, 16, 48), jnp.float32))
    fb = jax.nn.sigmoid(jax.random.normal(k4, (2, 4, 16, 48), jnp.float32))
    out_b = jax.block_until_ready(
        disc_loss(rb, fb, gan_type="vanilla", max_block_rows=16))
    ref_b = _reference(rb, fb, gan_type="vanilla")
    assert jnp.allclose(out_b, ref_b, rtol=1e-5, atol=1e-6), (out_b, ref_b)

    print("KERNEL_OK")
</pallas_src>

<mosaic_0001>
module attributes {stable_mosaic.version = 11 : i64} {
  func.func @_disc_loss_kernel(%arg0: i32, %arg1: i32, %arg2: memref<16x128xf32, #tpu.memory_space<vmem>>, %arg3: memref<16x128xf32, #tpu.memory_space<vmem>>, %arg4: memref<1x2x8x128xf32, #tpu.memory_space<vmem>>) attributes {dimension_semantics = [#tpu.dimension_semantics<parallel>, #tpu.dimension_semantics<arbitrary>], iteration_bounds = array<i64: 1, 1>, scalar_prefetch = 0 : i64, scratch_operands = 0 : i64, tpu.core_type = #tpu.core_type<tc>, window_params = [{transform_indices = @transform_0, window_bounds = array<i64: 16, 128>}, {transform_indices = @transform_1, window_bounds = array<i64: 16, 128>}, {transform_indices = @transform_2, window_bounds = array<i64: 1, 2, 8, 128>}]} {
    %c0_i32 = arith.constant 0 : i32
    %0 = arith.cmpi eq, %arg1, %c0_i32 : i32
    %1 = arith.extui %0 : i1 to i32
    %c0_i32_0 = arith.constant 0 : i32
    %2 = arith.cmpi ne, %1, %c0_i32_0 : i32
    scf.if %2 {
      %cst_25 = arith.constant 0.000000e+00 : f32
      %33 = vector.broadcast %cst_25 : f32 to vector<1x2x8x128xf32>
      %c0_26 = arith.constant 0 : index
      %c0_27 = arith.constant 0 : index
      %c0_28 = arith.constant 0 : index
      %c0_29 = arith.constant 0 : index
      %34 = vector.load %arg4[%c0_26, %c0_27, %c0_28, %c0_29] : memref<1x2x8x128xf32, #tpu.memory_space<vmem>>, vector<1x2x8x128xf32>
      tpu.vector_store %arg4[%c0_26, %c0_27, %c0_28, %c0_29], %33 {strides = array<i32>} : memref<1x2x8x128xf32, #tpu.memory_space<vmem>>, vector<1x2x8x128xf32>,
    } else {
    }
    %c0 = arith.constant 0 : index
    %c0_1 = arith.constant 0 : index
    %3 = vector.load %arg2[%c0, %c0_1] : memref<16x128xf32, #tpu.memory_space<vmem>>, vector<16x128xf32>
    %c0_2 = arith.constant 0 : index
    %c0_3 = arith.constant 0 : index
    %4 = vector.load %arg3[%c0_2, %c0_3] : memref<16x128xf32, #tpu.memory_space<vmem>>, vector<16x128xf32>
    %5 = math.log %3 : vector<16x128xf32>
    %cst = arith.constant 0.000000e+00 : f32
    %6 = vector.broadcast %cst : f32 to vector<16x128xf32>
    %7 = arith.subf %6, %5 : vector<16x128xf32>
    %cst_4 = arith.constant 1.000000e+02 : f32
    %8 = vector.broadcast %cst_4 : f32 to vector<16x128xf32>
    %9 = arith.minimumf %7, %8 : vector<16x128xf32>
    %cst_5 = arith.constant 1.000000e+00 : f32
    %10 = vector.broadcast %cst_5 : f32 to vector<16x128xf32>
    %11 = arith.subf %10, %4 : vector<16x128xf32>
    %12 = math.log %11 : vector<16x128xf32>
    %cst_6 = arith.constant 0.000000e+00 : f32
    %13 = vector.broadcast %cst_6 : f32 to vector<16x128xf32>
    %14 = arith.subf %13, %12 : vector<16x128xf32>
    %cst_7 = arith.constant 1.000000e+02 : f32
    %15 = vector.broadcast %cst_7 : f32 to vector<16x128xf32>
    %16 = arith.minimumf %14, %15 : vector<16x128xf32>
    %c0_8 = arith.constant 0 : index
    %c0_9 = arith.constant 0 : index
    %c0_10 = arith.constant 0 : index
    %c0_11 = arith.constant 0 : index
    %17 = vector.load %arg4[%c0_8, %c0_9, %c0_10, %c0_11] : memref<1x2x8x128xf32, #tpu.memory_space<vmem>>, vector<1x1x8x128xf32>
    %18 = vector.shape_cast %17 : vector<1x1x8x128xf32> to vector<8x128xf32>
    %19 = vector.shape_cast %9 : vector<16x128xf32> to vector<2x8x128xf32>
    %cst_12 = arith.constant dense<0.000000e+00> : vector<8x128xf32>
    %20 = vector.multi_reduction <add>, %19, %cst_12 [0] : vector<2x8x128xf32> to vector<8x128xf32>
    %21 = arith.addf %18, %20 : vector<8x128xf32>
    %c0_13 = arith.constant 0 : index
    %c0_14 = arith.constant 0 : index
    %c0_15 = arith.constant 0 : index
    %c0_16 = arith.constant 0 : index
    %22 = vector.load %arg4[%c0_13, %c0_14, %c0_15, %c0_16] : memref<1x2x8x128xf32, #tpu.memory_space<vmem>>, vector<1x1x8x128xf32>
    %23 = vector.shape_cast %22 : vector<1x1x8x128xf32> to vector<8x128xf32>
    %24 = vector.shape_cast %21 : vector<8x128xf32> to vector<1x1x8x128xf32>
    tpu.vector_store %arg4[%c0_13, %c0_14, %c0_15, %c0_16], %24 {strides = array<i32>} : memref<1x2x8x128xf32, #tpu.memory_space<vmem>>, vector<1x1x8x128xf32>,
    %c0_17 = arith.constant 0 : index
    %c1 = arith.constant 1 : index
    %c0_18 = arith.constant 0 : index
    %c0_19 = arith.constant 0 : index
    %25 = vector.load %arg4[%c0_17, %c1, %c0_18, %c0_19] : memref<1x2x8x128xf32, #tpu.memory_space<vmem>>, vector<1x1x8x128xf32>
    %26 = vector.shape_cast %25 : vector<1x1x8x128xf32> to vector<8x128xf32>
    %27 = vector.shape_cast %16 : vector<16x128xf32> to vector<2x8x128xf32>
    %cst_20 = arith.constant dense<0.000000e+00> : vector<8x128xf32>
    %28 = vector.multi_reduction <add>, %27, %cst_20 [0] : vector<2x8x128xf32> to vector<8x128xf32>
    %29 = arith.addf %26, %28 : vector<8x128xf32>
    %c0_21 = arith.constant 0 : index
    %c1_22 = arith.constant 1 : index
    %c0_23 = arith.constant 0 : index
    %c0_24 = arith.constant 0 : index
    %30 = vector.load %arg4[%c0_21, %c1_22, %c0_23, %c0_24] : memref<1x2x8x128xf32, #tpu.memory_space<vmem>>, vector<1x1x8x128xf32>
    %31 = vector.shape_cast %30 : vector<1x1x8x128xf32> to vector<8x128xf32>
    %32 = vector.shape_cast %29 : vector<8x128xf32> to vector<1x1x8x128xf32>
    tpu.vector_store %arg4[%c0_21, %c1_22, %c0_23, %c0_24], %32 {strides = array<i32>} : memref<1x2x8x128xf32, #tpu.memory_space<vmem>>, vector<1x1x8x128xf32>,
    return
  }
  func.func @transform_0(%arg0: i32, %arg1: i32) -> (i32, i32) {
    %c1_i32 = arith.constant 1 : i32
    %0 = arith.muli %arg0, %c1_i32 : i32
    %1 = arith.addi %0, %arg1 : i32
    %c0_i32 = arith.constant 0 : i32
    %2 = arith.minsi %1, %c0_i32 : i32
    %c0_i32_0 = arith.constant 0 : i32
    %c0_i32_1 = arith.constant 0 : i32
    return %2, %c0_i32_0 : i32, i32
  }
  func.func @transform_1(%arg0: i32, %arg1: i32) -> (i32, i32) {
    %c1_i32 = arith.constant 1 : i32
    %0 = arith.muli %arg0, %c1_i32 : i32
    %1 = arith.addi %0, %arg1 : i32
    %c0_i32 = arith.constant 0 : i32
    %2 = arith.minsi %1, %c0_i32 : i32
    %c0_i32_0 = arith.constant 0 : i32
    %c0_i32_1 = arith.constant 0 : i32
    return %2, %c0_i32_0 : i32, i32
  }
  func.func @transform_2(%arg0: i32, %arg1: i32) -> (i32, i32, i32, i32) {
    %c0_i32 = arith.constant 0 : i32
    %c0_i32_0 = arith.constant 0 : i32
    %c0_i32_1 = arith.constant 0 : i32
    %c0_i32_2 = arith.constant 0 : i32
    return %arg0, %c0_i32, %c0_i32_0, %c0_i32_1 : i32, i32, i32, i32
  }
}

</mosaic_0001>

<bundles_post_ra>
// kernel: tpu_custom_call.1
= control target key start
LH: loop header
LB: loop body
LE: loop exit
PB: predicated region body
PF: predicated region fallthrough
CT: control target
= control target key end

     0   :  { %7 = vsyncpa [#allocation3], 0  ;;  %s270_s0 = inlined_call_operand.hbm [shape: f32[16,128], index: 0, kind: input, shape index: {}]   ;;  %s271_s1 = inlined_call_operand.hbm [shape: f32[16,128], index: 1, kind: input, shape index: {}]   ;;  %s272_s2 = inlined_call_operand.hbm [shape: f32[1,2,8,128], index: 2, kind: output, shape index: {}]  }
   0x1   :  { %8 = vsyncpa [#allocation6], 0 }
   0x2   :  { %9 = vsyncpa [#allocation4], 0  ;;  %s205_s9 = smov [#allocation2]   ;;  %s133_s13 = scalar_lea.hbm %s270_s0, 256 }
   0x3   :  { %s21_s10 = sshll.u32 %s205_s9, 4  ;;  %p134_p0 = scmp.ne.s32.totalorder %s270_s0, %s133_s13  ;;  %s22_s10 = int_to_ptr.vmem [resolvable:$true] %s21_s10 }
   0x4   :  { %p137_p1 = scmp.lt.u32.totalorder %s133_s13, %s270_s0 }
   0x6   :  { %p139_p2 = pnand %p137_p1, %p134_p0 }
   0x8   :  { %142 = shalt.err (!%p139_p2)
}
   0x9   :  { %s143_s18 = scalar_lea.vmem %s22_s10, 256  ;;  %p148_p4 = scmp.lt.s32.totalorder %s22_s10, %s22_s10 }
   0xa   :  { %p144_p3 = scmp.ne.s32.totalorder %s22_s10, %s143_s18  ;;  %p149_p5 = scmp.lt.s32.totalorder %s143_s18, %s143_s18 }
   0xc   :  { %p150_p6 = por %p149_p5, %p148_p4 }
   0xe   :  { %p151_p7 = pnand %p150_p6, %p144_p3 }
  0x10   :  { %154 = shalt.err (!%p151_p7)
}
  0x11   :  { %s206_s19 = smov 128   ;;  %s207_s20 = smov 8  }
  0x12   :  { %27 = dma.hbm_to_vmem [thread:$0]  %s270_s0, 256, %s22_s10, [#allocation3], %s206_s19, %s206_s19, %s207_s20  }
  0x13   :  { %s208_s23 = smov [#allocation5]   ;;  %s155_s27 = scalar_lea.hbm %s271_s1, 256 }
  0x14   :  { %s39_s24 = sshll.u32 %s208_s23, 4  ;;  %p156_p8 = scmp.ne.s32.totalorder %s271_s1, %s155_s27  ;;  %s40_s24 = int_to_ptr.vmem [resolvable:$true] %s39_s24 }
  0x15   :  { %p159_p9 = scmp.lt.u32.totalorder %s155_s27, %s271_s1 }
  0x17   :  { %p161_p10 = pnand %p159_p9, %p156_p8 }
  0x19   :  { %164 = shalt.err (!%p161_p10)
}
  0x1a   :  { %s165_s4 = scalar_lea.vmem %s40_s24, 256  ;;  %p170_p12 = scmp.lt.s32.totalorder %s40_s24, %s40_s24 }
  0x1b   :  { %p166_p11 = scmp.ne.s32.totalorder %s40_s24, %s165_s4  ;;  %p171_p13 = scmp.lt.s32.totalorder %s165_s4, %s165_s4 }
  0x1d   :  { %p172_p0 = por %p171_p13, %p170_p12 }
  0x1f   :  { %p173_p1 = pnand %p172_p0, %p166_p11 }
  0x21   :  { %176 = shalt.err (!%p173_p1)
}
  0x22   :  { %45 = dma.hbm_to_vmem [thread:$0]  %s271_s1, 256, %s40_s24, [#allocation6], %s206_s19, %s206_s19, %s207_s20  }
  0x23   :  { %199 = dma.done.wait [#allocation3], 256  }
  0x24   :  { %200 = vsyncadd [#allocation3], 4294967040 }
  0x25   :  { %201 = dma.done.wait [#allocation6], 256  }
  0x26   :  { %202 = vsyncadd [#allocation6], 4294967040  ;;  %v66_v0 = vld [vmem:[#allocation2] sm:$0xff]  ;;  %v67_v1 = vld [vmem:[#allocation2 + $0x8] sm:$0xff]  ;;  %s209_s1 = smov [#allocation7]  }
  0x27   :  { %v68_v2 = vld [vmem:[#allocation5] sm:$0xff]  ;;  %125 = vlog2.f32 %v66_v0  ;;  %v69_v3 = vld [vmem:[#allocation5 + $0x8] sm:$0xff]  ;;  %s102_s6 = sshll.u32 %s209_s1, 4  ;;  %s103_s6 = int_to_ptr.vmem [resolvable:$true] %s102_s6 }
  0x28   :  { %v78_v4 = vsub.f32 1.0, %v68_v2  ;;  %127 = vlog2.f32 %v67_v1  ;;  %v79_v5 = vsub.f32 1.0, %v69_v3  ;;  %s177_s7 = scalar_lea.vmem %s103_s6, 256  ;;  %p182_p3 = scmp.lt.s32.totalorder %s103_s6, %s103_s6 }
  0x29   :  { %p178_p2 = scmp.ne.s32.totalorder %s103_s6, %s177_s7  ;;  %p183_p4 = scmp.lt.s32.totalorder %s177_s7, %s177_s7 }
  0x2a   :  { %129 = vlog2.f32 %v78_v4 }
  0x2b   :  { %131 = vlog2.f32 %v79_v5  ;;  %p184_p5 = por %p183_p4, %p182_p3 }
  0x2d   :  { %p185_p6 = pnand %p184_p5, %p178_p2 }
  0x31   :  { %v126_v6 = vpop.eup %125 }
  0x32   :  { %v128_v7 = vpop.eup %127  ;;  %v71_v8 = vmul.f32 0.6931472, %v126_v6 }
  0x33   :  { %v73_v10 = vmul.f32 0.6931472, %v128_v7 }
  0x34   :  { %v130_v9 = vpop.eup %129  ;;  %v74_v12 = vsub.f32 0.0, %v71_v8 }
  0x35   :  { %v132_v11 = vpop.eup %131  ;;  %v81_v13 = vmul.f32 0.6931472, %v130_v9  ;;  %v75_v14 = vsub.f32 0.0, %v73_v10 }
  0x36   :  { %v83_v15 = vmul.f32 0.6931472, %v132_v11  ;;  %v76_v16 = vmin.f32 %v74_v12, 100.0 }
  0x37   :  { %v84_v17 = vsub.f32 0.0, %v81_v13  ;;  %v77_v18 = vmin.f32 %v75_v14, 100.0 }
  0x38   :  { %v85_v19 = vsub.f32 0.0, %v83_v15 }
  0x39   :  { %v86_v20 = vmin.f32 %v84_v17, 100.0  ;;  %v89_v21 = vadd.f32 %v77_v18, %v76_v16 }
  0x3a   :  { %v87_v22 = vmin.f32 %v85_v19, 100.0 }
  0x3b   :  { %91 = vst [vmem:[#allocation7] sm:$0xff] %v89_v21 }
  0x3c   :  { %v94_v23 = vadd.f32 %v87_v22, %v86_v20 }
  0x3e   :  { %96 = vst [vmem:[#allocation7 + $0x8] sm:$0xff] %v94_v23 }
  0x3f   :  { %188 = shalt.err (!%p185_p6)
}
  0x40   :  { %s189_s10 = scalar_lea.hbm %s272_s2, 256 }
  0x41   :  { %p190_p7 = scmp.ne.s32.totalorder %s272_s2, %s189_s10  ;;  %p193_p8 = scmp.lt.u32.totalorder %s189_s10, %s272_s2 }
  0x43   :  { %p195_p9 = pnand %p193_p8, %p190_p7 }
  0x45   :  { %198 = shalt.err (!%p195_p9)
}
  0x46   :  { %108 = dma.vmem_to_hbm [thread:$0]  %s103_s6, 256, %s272_s2, [#allocation4], %s206_s19, %s206_s19, %s207_s20  }
  0x47   :  { %203 = dma.done.wait [#allocation4], 256  }
  0x48   :  { %204 = vsyncadd [#allocation4], 4294967040 }
  0x49   :  { %112 = vsyncpa [#allocation3], 1 }
  0x4a   :  { %113 = vsyncpa [#allocation6], 1 }
  0x4b   :  { %114 = vsyncpa [#allocation4], 1 }

</bundles_post_ra>
